<compile_context>
chip_gen: v7x
topology: tpu7x:2x2x1
jax: 0.10.0
libtpu: 0.0.40
codegen_flags: <defaults>
</compile_context>

<pallas_src>
import jax
import jax.numpy as jnp
from jax.experimental import pallas as pl
from jax.experimental.pallas import tpu as pltpu

_NEG_BIG = -1e30


def _round_up(a: int, b: int) -> int:
    return ((a + b - 1) // b) * b


def _make_kernel(n: int, tn: int, tiles_per_split: int, needs_mask: bool, h_dtype):
    """Build the tiled, lane-dense online-softmax pooling kernel."""

    def kernel(x_ref, w1_ref, b1_ref, w2_ref, b2_ref,      # inputs
               s_ref, m_ref, l_ref, z_ref):                # outputs (m/l/z are resident accumulators)
        i = pl.program_id(1)

        @pl.when(i == 0)
        def _init():
            m_ref[...] = jnp.full(m_ref.shape, _NEG_BIG, m_ref.dtype)
            l_ref[...] = jnp.zeros(l_ref.shape, l_ref.dtype)
            z_ref[...] = jnp.zeros(z_ref.shape, z_ref.dtype)

        # global row offset of this tile (UNclamped, used only for masking)
        base = (pl.program_id(0) * tiles_per_split + i) * tn

        x = x_ref[...]                                               # (tn, M) f32, streamed once
        if needs_mask:
            # zero padded/garbage rows so they cannot inject Inf/NaN into the matmuls
            row = base + jax.lax.broadcasted_iota(jnp.int32, (tn, 1), 0)
            x = jnp.where(row < n, x, 0.0)
        x_bf = x.astype(jnp.bfloat16)                                # in-kernel cast (no pre-pass)

        # attention MLP hidden layer on the MXU (bf16 inputs, f32 accumulation),
        # post-matmul chain in h_dtype (bf16 on v6e/v7x).
        h = jnp.dot(x_bf, w1_ref[...], preferred_element_type=jnp.float32)
        h = jnp.tanh(h.astype(h_dtype) + b1_ref[...])                # (tn, L)

        # L -> 1 projection produced directly in lane-dense (1, tn) layout:
        # w2 (1, L) contracted with h (tn, L) on their minor dims (a @ b.T form, MXU).
        s_row = jax.lax.dot_general(
            w2_ref[...], h, (((1,), (1,)), ((), ())),
            preferred_element_type=jnp.float32) + b2_ref[...]        # (1, tn) f32
        if needs_mask:
            col = base + jax.lax.broadcasted_iota(jnp.int32, (1, tn), 1)
            s_row = jnp.where(col < n, s_row, _NEG_BIG)
        s_ref[...] = s_row       # raw scores; O(N) softmax for the attention map in wrapper

        # ---- online-softmax accumulation of the un-normalised Z partial ----
        m_prev = m_ref[...]                                          # (1, 1)
        m_new = jnp.maximum(m_prev, jnp.max(s_row, axis=1, keepdims=True))
        alpha = jnp.exp(m_prev - m_new)
        p = jnp.exp(s_row - m_new)                                   # (1, tn), lane-dense
        l_ref[...] = alpha * l_ref[...] + jnp.sum(p, axis=1, keepdims=True)
        z_ref[...] = alpha * z_ref[...] + jnp.dot(
            p.astype(jnp.bfloat16), x_bf, preferred_element_type=jnp.float32)   # (1, M)
        m_ref[...] = m_new

    return kernel


def abmil_forward(x, params, *, block_n: int = 8192, num_splits: int = 2,
                  h_dtype=jnp.bfloat16):
    """Pallas forward for Attention.forward (dfp=None).

    Returns (logits, Y_prob, Y_hat, A, Z) with the same shapes/semantics as torch.
    num_splits=2 shards the bag over a leading "parallel" grid axis (v7x megacore);
    it runs serially (and stays correct) on single-TensorCore chips.
    """
    n, m_feat = x.shape
    l_feat = params["w1"].shape[1]

    # bag tile rows: multiple of 128 so the lane-dense score blocks are unmasked stores
    tn = min(_round_up(block_n, 128), _round_up(n, 128))
    tiles_total = pl.cdiv(n, tn)
    num_splits = max(1, min(num_splits, tiles_total))
    tiles_per_split = pl.cdiv(tiles_total, num_splits)
    n_pad = num_splits * tiles_per_split * tn
    needs_mask = (n_pad != n)

    # tiny one-time parameter casts (weights only; x itself is NOT copied/padded)
    w1 = params["w1"].astype(jnp.bfloat16)                      # (M, L)
    b1 = params["b1"].reshape(1, l_feat).astype(h_dtype)        # (1, L)
    w2 = params["w2"].reshape(1, l_feat).astype(h_dtype)        # (1, L) row vector
    b2 = params["b2"].reshape(1, 1).astype(jnp.float32)         # (1, 1)

    kernel = _make_kernel(n, tn, tiles_per_split, needs_mask, h_dtype)

    def x_map(s, i):
        # clamp so the DMA source block always overlaps the array; fully-padded steps
        # just re-read the last real tile and are masked out in-kernel.
        return (jnp.minimum(s * tiles_per_split + i, tiles_total - 1), 0)

    cost = pl.CostEstimate(
        flops=2 * n_pad * m_feat * l_feat + 2 * n_pad * (l_feat + m_feat),
        transcendentals=n_pad * (l_feat + 1),
        bytes_accessed=(n_pad * m_feat * 4 + m_feat * l_feat * 2
                        + n_pad * 4 + num_splits * (m_feat + 2) * 4 + 2 * l_feat * 4),
    )

    scores, m_part, l_part, z_part = pl.pallas_call(
        kernel,
        grid=(num_splits, tiles_per_split),
        in_specs=[
            pl.BlockSpec((tn, m_feat), x_map),                       # x f32 tile (streamed once)
            pl.BlockSpec((m_feat, l_feat), lambda s, i: (0, 0)),     # W1 (resident, bf16)
            pl.BlockSpec((1, l_feat), lambda s, i: (0, 0)),          # b1
            pl.BlockSpec((1, l_feat), lambda s, i: (0, 0)),          # w2 as a row vector
            pl.BlockSpec((1, 1), lambda s, i: (0, 0)),               # b2
        ],
        out_specs=(
            pl.BlockSpec((1, tn), lambda s, i: (0, s * tiles_per_split + i)),  # lane-dense scores
            pl.BlockSpec((None, 1, 1), lambda s, i: (s, 0, 0)),      # per-split running max m
            pl.BlockSpec((None, 1, 1), lambda s, i: (s, 0, 0)),      # per-split denom l
            pl.BlockSpec((None, 1, m_feat), lambda s, i: (s, 0, 0)), # per-split unnormalised Z
        ),
        out_shape=(
            jax.ShapeDtypeStruct((1, n_pad), jnp.float32),
            jax.ShapeDtypeStruct((num_splits, 1, 1), jnp.float32),
            jax.ShapeDtypeStruct((num_splits, 1, 1), jnp.float32),
            jax.ShapeDtypeStruct((num_splits, 1, m_feat), jnp.float32),
        ),
        compiler_params=pltpu.CompilerParams(
            dimension_semantics=("parallel", "arbitrary"),   # split axis parallel, bag is a reduction
            vmem_limit_bytes=48 * 1024 * 1024,
        ),
        cost_estimate=cost,
    )(x, w1, b1, w2, b2)

    # --- tiny XLA epilogue: exact log-sum-exp merge of the per-split partials ---
    m_s = m_part.reshape(num_splits)
    l_s = l_part.reshape(num_splits)
    z_s = z_part.reshape(num_splits, m_feat)
    m_g = jnp.max(m_s)
    w_s = jnp.exp(m_s - m_g)                                   # empty splits (m=-BIG) -> 0
    denom = jnp.sum(l_s * w_s)
    z = jnp.sum(z_s * w_s[:, None], axis=0, keepdims=True) / denom     # exact divide, (1, M)

    a = jax.nn.softmax(scores[0, :n])[None, :]                 # (1, N) attention map
    logits = z @ params["wc"] + params["bc"]                   # (1, C)
    y_prob = jax.nn.softmax(logits, axis=1)
    y_hat = jnp.argmax(logits, axis=1)
    return logits, y_prob, y_hat, a, z


def init_params(key, M, L, n_classes):
    k1, k2, k3 = jax.random.split(key, 3)
    scale = 0.05
    return {
        "w1": scale * jax.random.normal(k1, (M, L), jnp.float32),
        "b1": jnp.zeros((1, L), jnp.float32),
        "w2": scale * jax.random.normal(k2, (L, 1), jnp.float32),
        "b2": jnp.zeros((1, 1), jnp.float32),
        "wc": scale * jax.random.normal(k3, (M, n_classes), jnp.float32),
        "bc": jnp.zeros((1, n_classes), jnp.float32),
    }


def reference_forward(x, p, match_kernel=False):
    """Pure-JAX reference. match_kernel=True mimics the kernel's bf16/f32 mixed math."""
    if match_kernel:
        xw = x.astype(jnp.bfloat16)
        h = jnp.dot(xw, p["w1"].astype(jnp.bfloat16), preferred_element_type=jnp.float32)
        h = jnp.tanh(h.astype(jnp.bfloat16) + p["b1"].reshape(1, -1).astype(jnp.bfloat16))
        s = jnp.dot(h, p["w2"].astype(jnp.bfloat16),
                    preferred_element_type=jnp.float32) + p["b2"]               # (N, 1)
        pw = jnp.exp(s - jnp.max(s))
        z = jax.lax.dot_general(pw.astype(jnp.bfloat16), xw, (((0,), (0,)), ((), ())),
                                preferred_element_type=jnp.float32) / jnp.sum(pw)
    else:
        h = jnp.tanh(x @ p["w1"] + p["b1"])
        s = h @ p["w2"] + p["b2"]                                               # (N, 1)
        pw = jax.nn.softmax(s, axis=0)
        z = pw.T @ x                                                            # (1, M)
    a = jax.nn.softmax(s.T, axis=1)                                             # (1, N)
    logits = z @ p["wc"] + p["bc"]
    return logits, jax.nn.softmax(logits, axis=1), jnp.argmax(logits, axis=1), a, z


def _check_outputs(outs, x, params):
    logits, y_prob, y_hat, a, z = outs
    for match, tol in ((True, 1e-2), (False, 3e-2)):
        r_logits, r_prob, r_yhat, r_a, r_z = reference_forward(x, params, match_kernel=match)
        assert jnp.allclose(logits, r_logits, atol=tol, rtol=tol)
        assert jnp.allclose(y_prob, r_prob, atol=tol, rtol=tol)
        assert jnp.allclose(a, r_a, atol=tol, rtol=tol)
        assert jnp.allclose(z, r_z, atol=tol, rtol=tol)
        if match:
            assert bool(jnp.all(y_hat == r_yhat))


if __name__ == "__main__":
    # size='tiny' -> M=192, L=128; n_classes=2
    M, L, C = 192, 128, 2
    key = jax.random.PRNGKey(0)
    kx1, kx2, kx3, kp = jax.random.split(key, 4)
    params = init_params(kp, M, L, C)

    # small bag: single tile, single split, edge-row masking
    x1 = jax.random.normal(kx1, (8, M), jnp.float32)
    outs1 = jax.block_until_ready(abmil_forward(x1, params))
    _check_outputs(outs1, x1, params)

    # larger bag: 2-way split + multi-tile online softmax + a fully padded edge tile
    x2 = jax.random.normal(kx2, (300, M), jnp.float32)
    outs2 = jax.block_until_ready(abmil_forward(x2, params, block_n=128))
    _check_outputs(outs2, x2, params)

    # exactly divisible bag: exercises the needs_mask=False kernel variant
    x3 = jax.random.normal(kx3, (256, M), jnp.float32)
    outs3 = jax.block_until_ready(abmil_forward(x3, params, block_n=128))
    _check_outputs(outs3, x3, params)

    print("KERNEL_OK")
</pallas_src>

<mosaic_0001>
module attributes {stable_mosaic.version = 11 : i64} {
  func.func @kernel(%arg0: i32, %arg1: i32, %arg2: memref<128x192xf32, #tpu.memory_space<vmem>>, %arg3: memref<192x128xbf16, #tpu.memory_space<vmem>>, %arg4: memref<1x128xbf16, #tpu.memory_space<vmem>>, %arg5: memref<1x128xbf16, #tpu.memory_space<vmem>>, %arg6: memref<1x1xf32, #tpu.memory_space<vmem>>, %arg7: memref<1x128xf32, #tpu.memory_space<vmem>>, %arg8: memref<1x1x1xf32, #tpu.memory_space<vmem>>, %arg9: memref<1x1x1xf32, #tpu.memory_space<vmem>>, %arg10: memref<1x1x192xf32, #tpu.memory_space<vmem>>) attributes {dimension_semantics = [#tpu.dimension_semantics<parallel>, #tpu.dimension_semantics<arbitrary>], iteration_bounds = array<i64: 1, 1>, scalar_prefetch = 0 : i64, scratch_operands = 0 : i64, tpu.core_type = #tpu.core_type<tc>, window_params = [{transform_indices = @transform_0, window_bounds = array<i64: 128, 192>}, {pipeline_mode = #tpu.pipeline_mode<synchronous>, transform_indices = @transform_1, window_bounds = array<i64: 192, 128>}, {pipeline_mode = #tpu.pipeline_mode<synchronous>, transform_indices = @transform_2, window_bounds = array<i64: 1, 128>}, {pipeline_mode = #tpu.pipeline_mode<synchronous>, transform_indices = @transform_3, window_bounds = array<i64: 1, 128>}, {pipeline_mode = #tpu.pipeline_mode<synchronous>, transform_indices = @transform_4, window_bounds = array<i64: 1, 1>}, {transform_indices = @transform_5, window_bounds = array<i64: 1, 128>}, {transform_indices = @transform_6, window_bounds = array<i64: 1, 1, 1>}, {transform_indices = @transform_7, window_bounds = array<i64: 1, 1, 1>}, {transform_indices = @transform_8, window_bounds = array<i64: 1, 1, 192>}]} {
    %c0_i32 = arith.constant 0 : i32
    %0 = arith.cmpi eq, %arg1, %c0_i32 : i32
    %1 = arith.extui %0 : i1 to i32
    %c0_i32_0 = arith.constant 0 : i32
    %2 = arith.cmpi ne, %1, %c0_i32_0 : i32
    scf.if %2 {
      %cst_37 = arith.constant -1.000000e+30 : f32
      %69 = vector.broadcast %cst_37 : f32 to vector<1x1xf32>
      %c0_38 = arith.constant 0 : index
      %c0_39 = arith.constant 0 : index
      %c0_40 = arith.constant 0 : index
      %70 = vector.load %arg8[%c0_38, %c0_39, %c0_40] : memref<1x1x1xf32, #tpu.memory_space<vmem>>, vector<1x1x1xf32>
      %71 = vector.shape_cast %70 : vector<1x1x1xf32> to vector<1x1xf32>
      %72 = vector.shape_cast %69 : vector<1x1xf32> to vector<1x1x1xf32>
      tpu.vector_store %arg8[%c0_38, %c0_39, %c0_40], %72 {strides = array<i32>} : memref<1x1x1xf32, #tpu.memory_space<vmem>>, vector<1x1x1xf32>,
      %cst_41 = arith.constant 0.000000e+00 : f32
      %73 = vector.broadcast %cst_41 : f32 to vector<1x1xf32>
      %c0_42 = arith.constant 0 : index
      %c0_43 = arith.constant 0 : index
      %c0_44 = arith.constant 0 : index
      %74 = vector.load %arg9[%c0_42, %c0_43, %c0_44] : memref<1x1x1xf32, #tpu.memory_space<vmem>>, vector<1x1x1xf32>
      %75 = vector.shape_cast %74 : vector<1x1x1xf32> to vector<1x1xf32>
      %76 = vector.shape_cast %73 : vector<1x1xf32> to vector<1x1x1xf32>
      tpu.vector_store %arg9[%c0_42, %c0_43, %c0_44], %76 {strides = array<i32>} : memref<1x1x1xf32, #tpu.memory_space<vmem>>, vector<1x1x1xf32>,
      %cst_45 = arith.constant 0.000000e+00 : f32
      %77 = vector.broadcast %cst_45 : f32 to vector<1x192xf32>
      %c0_46 = arith.constant 0 : index
      %c0_47 = arith.constant 0 : index
      %c0_48 = arith.constant 0 : index
      %78 = vector.load %arg10[%c0_46, %c0_47, %c0_48] : memref<1x1x192xf32, #tpu.memory_space<vmem>>, vector<1x1x192xf32>
      %79 = vector.shape_cast %78 : vector<1x1x192xf32> to vector<1x192xf32>
      %80 = vector.shape_cast %77 : vector<1x192xf32> to vector<1x1x192xf32>
      tpu.vector_store %arg10[%c0_46, %c0_47, %c0_48], %80 {strides = array<i32>} : memref<1x1x192xf32, #tpu.memory_space<vmem>>, vector<1x1x192xf32>,
    } else {
    }
    %c1_i32 = arith.constant 1 : i32
    %3 = arith.muli %arg0, %c1_i32 : i32
    %4 = arith.addi %3, %arg1 : i32
    %c128_i32 = arith.constant 128 : i32
    %5 = arith.muli %4, %c128_i32 : i32
    %c0 = arith.constant 0 : index
    %c0_1 = arith.constant 0 : index
    %6 = vector.load %arg2[%c0, %c0_1] : memref<128x192xf32, #tpu.memory_space<vmem>>, vector<128x192xf32>
    %7 = tpu.iota {dimensions = array<i32: 0>} : vector<128x1xi32>
    %8 = vector.broadcast %5 : i32 to vector<128x1xi32>
    %9 = arith.addi %8, %7 : vector<128x1xi32>
    %c8_i32 = arith.constant 8 : i32
    %10 = vector.broadcast %c8_i32 : i32 to vector<128x1xi32>
    %11 = arith.cmpi slt, %9, %10 : vector<128x1xi32>
    %cst = arith.constant 0.000000e+00 : f32
    %12 = vector.shape_cast %11 : vector<128x1xi1> to vector<128x1xi1>
    %13 = vector.broadcast %12 : vector<128x1xi1> to vector<128x192xi1>
    %14 = vector.broadcast %cst : f32 to vector<128x192xf32>
    %15 = arith.select %13, %6, %14 : vector<128x192xi1>, vector<128x192xf32>
    %16 = arith.truncf %15 : vector<128x192xf32> to vector<128x192xbf16>
    %c0_2 = arith.constant 0 : index
    %c0_3 = arith.constant 0 : index
    %17 = vector.load %arg3[%c0_2, %c0_3] : memref<192x128xbf16, #tpu.memory_space<vmem>>, vector<192x128xbf16>
    %cst_4 = arith.constant dense<0.000000e+00> : vector<128x128xf32>
    %18 = tpu.matmul %16, %17, %cst_4 {dimension_numbers = #tpu.dot_dimension_numbers<[1], [0], [0], [1], [0, 0, 1, 1], [], []>} : vector<128x192xbf16>, vector<192x128xbf16>, vector<128x128xf32> -> vector<128x128xf32>
    %19 = arith.truncf %18 : vector<128x128xf32> to vector<128x128xbf16>
    %c0_5 = arith.constant 0 : index
    %c0_6 = arith.constant 0 : index
    %20 = vector.load %arg4[%c0_5, %c0_6] : memref<1x128xbf16, #tpu.memory_space<vmem>>, vector<1x128xbf16>
    %21 = vector.broadcast %20 : vector<1x128xbf16> to vector<128x128xbf16>
    %22 = arith.addf %19, %21 : vector<128x128xbf16>
    %23 = math.tanh %22 : vector<128x128xbf16>
    %c0_7 = arith.constant 0 : index
    %c0_8 = arith.constant 0 : index
    %24 = vector.load %arg5[%c0_7, %c0_8] : memref<1x128xbf16, #tpu.memory_space<vmem>>, vector<1x128xbf16>
    %cst_9 = arith.constant dense<0.000000e+00> : vector<1x128xf32>
    %25 = tpu.matmul %24, %23, %cst_9 {dimension_numbers = #tpu.dot_dimension_numbers<[1], [1], [0], [0], [0, 0, 1, 0], [], []>} : vector<1x128xbf16>, vector<128x128xbf16>, vector<1x128xf32> -> vector<1x128xf32>
    %c0_10 = arith.constant 0 : index
    %c0_11 = arith.constant 0 : index
    %26 = vector.load %arg6[%c0_10, %c0_11] : memref<1x1xf32, #tpu.memory_space<vmem>>, vector<1x1xf32>
    %27 = vector.broadcast %26 : vector<1x1xf32> to vector<1x128xf32>
    %28 = arith.addf %25, %27 : vector<1x128xf32>
    %29 = tpu.iota {dimensions = array<i32: 1>} : vector<1x128xi32>
    %30 = vector.broadcast %5 : i32 to vector<1x128xi32>
    %31 = arith.addi %30, %29 : vector<1x128xi32>
    %c8_i32_12 = arith.constant 8 : i32
    %32 = vector.broadcast %c8_i32_12 : i32 to vector<1x128xi32>
    %33 = arith.cmpi slt, %31, %32 : vector<1x128xi32>
    %cst_13 = arith.constant -1.000000e+30 : f32
    %34 = vector.broadcast %cst_13 : f32 to vector<1x128xf32>
    %35 = arith.select %33, %28, %34 : vector<1x128xi1>, vector<1x128xf32>
    %c0_14 = arith.constant 0 : index
    %c0_15 = arith.constant 0 : index
    %36 = vector.load %arg7[%c0_14, %c0_15] : memref<1x128xf32, #tpu.memory_space<vmem>>, vector<1x128xf32>
    tpu.vector_store %arg7[%c0_14, %c0_15], %35 {strides = array<i32>} : memref<1x128xf32, #tpu.memory_space<vmem>>, vector<1x128xf32>,
    %c0_16 = arith.constant 0 : index
    %c0_17 = arith.constant 0 : index
    %c0_18 = arith.constant 0 : index
    %37 = vector.load %arg8[%c0_16, %c0_17, %c0_18] : memref<1x1x1xf32, #tpu.memory_space<vmem>>, vector<1x1x1xf32>
    %38 = vector.shape_cast %37 : vector<1x1x1xf32> to vector<1x1xf32>
    %cst_19 = arith.constant dense<0xFF800000> : vector<1xf32>
    %39 = vector.multi_reduction <maximumf>, %35, %cst_19 [1] : vector<1x128xf32> to vector<1xf32>
    %40 = vector.shape_cast %39 : vector<1xf32> to vector<1x1xf32>
    %41 = arith.maximumf %38, %40 : vector<1x1xf32>
    %42 = arith.subf %38, %41 : vector<1x1xf32>
    %43 = math.exp %42 : vector<1x1xf32>
    %44 = vector.broadcast %41 : vector<1x1xf32> to vector<1x128xf32>
    %45 = arith.subf %35, %44 : vector<1x128xf32>
    %46 = math.exp %45 : vector<1x128xf32>
    %c0_20 = arith.constant 0 : index
    %c0_21 = arith.constant 0 : index
    %c0_22 = arith.constant 0 : index
    %47 = vector.load %arg9[%c0_20, %c0_21, %c0_22] : memref<1x1x1xf32, #tpu.memory_space<vmem>>, vector<1x1x1xf32>
    %48 = vector.shape_cast %47 : vector<1x1x1xf32> to vector<1x1xf32>
    %49 = arith.mulf %43, %48 : vector<1x1xf32>
    %cst_23 = arith.constant dense<0.000000e+00> : vector<1xf32>
    %50 = vector.multi_reduction <add>, %46, %cst_23 [1] : vector<1x128xf32> to vector<1xf32>
    %51 = vector.shape_cast %50 : vector<1xf32> to vector<1x1xf32>
    %52 = arith.addf %49, %51 : vector<1x1xf32>
    %c0_24 = arith.constant 0 : index
    %c0_25 = arith.constant 0 : index
    %c0_26 = arith.constant 0 : index
    %53 = vector.load %arg9[%c0_24, %c0_25, %c0_26] : memref<1x1x1xf32, #tpu.memory_space<vmem>>, vector<1x1x1xf32>
    %54 = vector.shape_cast %53 : vector<1x1x1xf32> to vector<1x1xf32>
    %55 = vector.shape_cast %52 : vector<1x1xf32> to vector<1x1x1xf32>
    tpu.vector_store %arg9[%c0_24, %c0_25, %c0_26], %55 {strides = array<i32>} : memref<1x1x1xf32, #tpu.memory_space<vmem>>, vector<1x1x1xf32>,
    %c0_27 = arith.constant 0 : index
    %c0_28 = arith.constant 0 : index
    %c0_29 = arith.constant 0 : index
    %56 = vector.load %arg10[%c0_27, %c0_28, %c0_29] : memref<1x1x192xf32, #tpu.memory_space<vmem>>, vector<1x1x192xf32>
    %57 = vector.shape_cast %56 : vector<1x1x192xf32> to vector<1x192xf32>
    %58 = vector.broadcast %43 : vector<1x1xf32> to vector<1x192xf32>
    %59 = arith.mulf %58, %57 : vector<1x192xf32>
    %60 = arith.truncf %46 : vector<1x128xf32> to vector<1x128xbf16>
    %cst_30 = arith.constant dense<0.000000e+00> : vector<1x192xf32>
    %61 = tpu.matmul %60, %16, %cst_30 {dimension_numbers = #tpu.dot_dimension_numbers<[1], [0], [0], [1], [0, 0, 1, 1], [], []>} : vector<1x128xbf16>, vector<128x192xbf16>, vector<1x192xf32> -> vector<1x192xf32>
    %62 = arith.addf %59, %61 : vector<1x192xf32>
    %c0_31 = arith.constant 0 : index
    %c0_32 = arith.constant 0 : index
    %c0_33 = arith.constant 0 : index
    %63 = vector.load %arg10[%c0_31, %c0_32, %c0_33] : memref<1x1x192xf32, #tpu.memory_space<vmem>>, vector<1x1x192xf32>
    %64 = vector.shape_cast %63 : vector<1x1x192xf32> to vector<1x192xf32>
    %65 = vector.shape_cast %62 : vector<1x192xf32> to vector<1x1x192xf32>
    tpu.vector_store %arg10[%c0_31, %c0_32, %c0_33], %65 {strides = array<i32>} : memref<1x1x192xf32, #tpu.memory_space<vmem>>, vector<1x1x192xf32>,
    %c0_34 = arith.constant 0 : index
    %c0_35 = arith.constant 0 : index
    %c0_36 = arith.constant 0 : index
    %66 = vector.load %arg8[%c0_34, %c0_35, %c0_36] : memref<1x1x1xf32, #tpu.memory_space<vmem>>, vector<1x1x1xf32>
    %67 = vector.shape_cast %66 : vector<1x1x1xf32> to vector<1x1xf32>
    %68 = vector.shape_cast %41 : vector<1x1xf32> to vector<1x1x1xf32>
    tpu.vector_store %arg8[%c0_34, %c0_35, %c0_36], %68 {strides = array<i32>} : memref<1x1x1xf32, #tpu.memory_space<vmem>>, vector<1x1x1xf32>,
    return
  }
  func.func @transform_0(%arg0: i32, %arg1: i32) -> (i32, i32) {
    %c1_i32 = arith.constant 1 : i32
    %0 = arith.muli %arg0, %c1_i32 : i32
    %1 = arith.addi %0, %arg1 : i32
    %c0_i32 = arith.constant 0 : i32
    %2 = arith.minsi %1, %c0_i32 : i32
    %c0_i32_0 = arith.constant 0 : i32
    %c0_i32_1 = arith.constant 0 : i32
    return %2, %c0_i32_0 : i32, i32
  }
  func.func @transform_1(%arg0: i32, %arg1: i32) -> (i32, i32) {
    %c0_i32 = arith.constant 0 : i32
    %c0_i32_0 = arith.constant 0 : i32
    %c0_i32_1 = arith.constant 0 : i32
    return %c0_i32, %c0_i32_0 : i32, i32
  }
  func.func @transform_2(%arg0: i32, %arg1: i32) -> (i32, i32) {
    %c0_i32 = arith.constant 0 : i32
    %c0_i32_0 = arith.constant 0 : i32
    %c0_i32_1 = arith.constant 0 : i32
    return %c0_i32, %c0_i32_0 : i32, i32
  }
  func.func @transform_3(%arg0: i32, %arg1: i32) -> (i32, i32) {
    %c0_i32 = arith.constant 0 : i32
    %c0_i32_0 = arith.constant 0 : i32
    %c0_i32_1 = arith.constant 0 : i32
    return %c0_i32, %c0_i32_0 : i32, i32
  }
  func.func @transform_4(%arg0: i32, %arg1: i32) -> (i32, i32) {
    %c0_i32 = arith.constant 0 : i32
    %c0_i32_0 = arith.constant 0 : i32
    %c0_i32_1 = arith.constant 0 : i32
    return %c0_i32, %c0_i32_0 : i32, i32
  }
  func.func @transform_5(%arg0: i32, %arg1: i32) -> (i32, i32) {
    %c1_i32 = arith.constant 1 : i32
    %0 = arith.muli %arg0, %c1_i32 : i32
    %1 = arith.addi %0, %arg1 : i32
    %c0_i32 = arith.constant 0 : i32
    %c0_i32_0 = arith.constant 0 : i32
    return %c0_i32, %1 : i32, i32
  }
  func.func @transform_6(%arg0: i32, %arg1: i32) -> (i32, i32, i32) {
    %c0_i32 = arith.constant 0 : i32
    %c0_i32_0 = arith.constant 0 : i32
    %c0_i32_1 = arith.constant 0 : i32
    return %arg0, %c0_i32, %c0_i32_0 : i32, i32, i32
  }
  func.func @transform_7(%arg0: i32, %arg1: i32) -> (i32, i32, i32) {
    %c0_i32 = arith.constant 0 : i32
    %c0_i32_0 = arith.constant 0 : i32
    %c0_i32_1 = arith.constant 0 : i32
    return %arg0, %c0_i32, %c0_i32_0 : i32, i32, i32
  }
  func.func @transform_8(%arg0: i32, %arg1: i32) -> (i32, i32, i32) {
    %c0_i32 = arith.constant 0 : i32
    %c0_i32_0 = arith.constant 0 : i32
    %c0_i32_1 = arith.constant 0 : i32
    return %arg0, %c0_i32, %c0_i32_0 : i32, i32, i32
  }
}

</mosaic_0001>

<bundles_post_ra>
// kernel: tpu_custom_call.1
= control target key start
LH: loop header
LB: loop body
LE: loop exit
PB: predicated region body
PF: predicated region fallthrough
CT: control target
= control target key end

     0   :  { %s1179_s0 = inlined_call_operand.hbm [shape: f32[8,192], index: 0, kind: input, shape index: {}]   ;;  %s1180_s1 = inlined_call_operand.hbm [shape: bf16[192,128], index: 1, kind: input, shape index: {}]   ;;  %s1181_s2 = inlined_call_operand.vmem [shape: bf16[1,128], index: 2, kind: input, shape index: {}]   ;;  %s1182_s3 = inlined_call_operand.vmem [shape: bf16[1,128], index: 3, kind: input, shape index: {}]   ;;  %s1183_s4 = inlined_call_operand.<no memory space> [shape: f32[1,1], index: 4, kind: input, shape index: {}]   ;;  %s1184_s5 = inlined_call_operand.hbm [shape: f32[1,128], index: 5, kind: output, shape index: {0}]   ;;  %s1185_s6 = inlined_call_operand.hbm [shape: f32[1,1,1], index: 6, kind: output, shape index: {1}]   ;;  %s1186_s7 = inlined_call_operand.hbm [shape: f32[1,1,1], index: 7, kind: output, shape index: {2}]   ;;  %s1187_s8 = inlined_call_operand.hbm [shape: f32[1,1,192], index: 8, kind: output, shape index: {3}]  }
   0x1   :  { %v14_v0 = vstv %s1183_s4 }
   0x2   :  { %15 = vst [vmem:[#allocation2] sm:$0x1] %v14_v0 }
   0x3   :  { %16 = vsyncpa [#allocation4], 0 }
   0x4   :  { %17 = vsyncpa [#allocation7], 0 }
   0x5   :  { %18 = vsyncpa [#allocation5], 0 }
   0x6   :  { %19 = vsyncpa [#allocation10], 0 }
   0x7   :  { %20 = vsyncpa [#allocation13], 0 }
   0x8   :  { %32 = vsyncadd [#allocation4], 3840  ;;  %s964_s29 = smov [#allocation3]   ;;  %s822_s11 = scalar_lea.hbm %s1179_s0, 256 }
   0x9   :  { %s38_s30 = sshll.u32 %s964_s29, 4  ;;  %p823_p0 = scmp.ne.s32.totalorder %s1179_s0, %s822_s11  ;;  %s39_s30 = int_to_ptr.vmem [resolvable:$true] %s38_s30 }
   0xa   :  { %p826_p1 = scmp.lt.u32.totalorder %s822_s11, %s1179_s0 }
   0xc   :  { %p828_p2 = pnand %p826_p1, %p823_p0 }
   0xe   :  { %831 = shalt.err (!%p828_p2)
}
   0xf   :  { %s832_s15 = scalar_lea.vmem %s39_s30, 256  ;;  %s836_s16 = scalar_lea.vmem %s39_s30, 4096 }
  0x10   :  { %p833_p3 = scmp.ne.s32.totalorder %s39_s30, %s832_s15  ;;  %p837_p4 = scmp.lt.s32.totalorder %s39_s30, %s39_s30 }
  0x11   :  { %p838_p5 = scmp.lt.s32.totalorder %s836_s16, %s832_s15 }
  0x13   :  { %p839_p6 = por %p838_p5, %p837_p4 }
  0x15   :  { %p840_p7 = pnand %p839_p6, %p833_p3 }
  0x17   :  { %843 = shalt.err (!%p840_p7)
}
  0x18   :  { %s965_s17 = smov 256   ;;  %s966_s18 = smov 16  }
  0x19   :  { %44 = dma.hbm_to_vmem [thread:$0]  %s1179_s0, 256, %s39_s30, [#allocation4], %s965_s17, %s965_s17, %s966_s18  }
  0x1a   :  { %s967_s21 = smov [#allocation6]   ;;  %s844_s25 = scalar_lea.hbm %s1180_s1, 1536 }
  0x1b   :  { %s50_s22 = sshll.u32 %s967_s21, 4  ;;  %p845_p8 = scmp.ne.s32.totalorder %s1180_s1, %s844_s25  ;;  %s51_s22 = int_to_ptr.vmem [resolvable:$true] %s50_s22 }
  0x1c   :  { %p848_p9 = scmp.lt.u32.totalorder %s844_s25, %s1180_s1 }
  0x1e   :  { %p850_p10 = pnand %p848_p9, %p845_p8 }
  0x20   :  { %853 = shalt.err (!%p850_p10)
}
  0x21   :  { %s854_s9 = scalar_lea.vmem %s51_s22, 1536  ;;  %p859_p12 = scmp.lt.s32.totalorder %s51_s22, %s51_s22 }
  0x22   :  { %p855_p11 = scmp.ne.s32.totalorder %s51_s22, %s854_s9  ;;  %p860_p13 = scmp.lt.s32.totalorder %s854_s9, %s854_s9 }
  0x24   :  { %p861_p0 = por %p860_p13, %p859_p12 }
  0x26   :  { %p862_p1 = pnand %p861_p0, %p855_p11 }
  0x28   :  { %865 = shalt.err (!%p862_p1)
}
  0x29   :  { %s968_s0 = smov 64   ;;  %s969_s30 = smov 4  }
  0x2a   :  { %56 = dma.hbm_to_vmem [thread:$0]  %s1180_s1, 1536, %s51_s22, [#allocation7], %s968_s0, %s968_s0, %s969_s30  }
  0x2b   :  { %954 = dma.done.wait [#allocation4], 4096  }
  0x2c   :  { %955 = vsyncadd [#allocation4], 4294963200 }
  0x2d   :  { %956 = dma.done.wait [#allocation7], 1536  }
  0x2e   :  { %957 = vsyncadd [#allocation7], 4294965760  ;;  %v970_v1 = vmov 0   ;;  %v971_v2 = vmov 0.0   ;;  %v790_v3 = vld [vmem:[#allocation6] sm:$0xff]   ;;  %v791_v4 = vld [vmem:[#allocation6 + $0x8] sm:$0xff]   ;;  %v85_v21 = vlaneseq }
  0x2f   :  { %375 = vmatprep.subr.bf16.mxu0 %v970_v1  ;;  %752 = vmatprep.subr.bf16.mxu1 %v971_v2  ;;  %v792_v5 = vld [vmem:[#allocation6 + $0x10] sm:$0xff]   ;;  %v793_v6 = vld [vmem:[#allocation6 + $0x18] sm:$0xff]   ;;  %v93_v7 = vld [vmem:[#allocation3 + $0x8] sm:$0xff]  ;;  %vm350_vm0 = vcmask 523264   ;;  %v972_v19 = vmov 0.0|0.0   ;;  %vm973_vm1 = vmmov 0  }
  0x30   :  { %788 = vset.pattern.permute.xlu0 %v970_v1  ;;  %789 = vset.pattern.permute.xlu1 %v970_v1  ;;  %v1060_v8 = vpack.c.bf16 %v971_v2, %v93_v7  ;;  %v794_v9 = vld [vmem:[#allocation6 + $0x20] sm:$0xff]   ;;  %v795_v10 = vld [vmem:[#allocation6 + $0x28] sm:$0xff]   ;;  %v796_v11 = vld [vmem:[#allocation6 + $0x30] sm:$0xff]   ;;  %v1077_v22 = vshrl.u32 %v85_v21, 7  ;;  %vm82_vm2 = vcmask 0   ;;  %vm562_vm4 = vcmask 1040384  }
  0x31   :  { %376 = vmatpush1.bf16.msra.mxu0 %v790_v3  ;;  %v797_v12 = vld [vmem:[#allocation6 + $0x38] sm:$0xff]   ;;  %v798_v13 = vld [vmem:[#allocation6 + $0x40] sm:$0xff]   ;;  %v799_v14 = vld [vmem:[#allocation6 + $0x48] sm:$0xff]   ;;  %768 = vmatprep.mubr.msk.bf16.mxu1 %vm973_vm1, %v971_v2  ;;  %84 = vst.msk [vmem:[#allocation11] sm:$0x1] %vm82_vm2, %v971_v2  ;;  %vm1117_vm5 = vcmp.lt.s32.totalorder %v85_v21, 192 }
  0x32   :  { %377 = vmatprep.subr.bf16.mxu0 %v970_v1  ;;  %742 = vmatprep.mubr.msk.bf16.mxu0 %vm350_vm0, %v1060_v8  ;;  %v800_v15 = vld [vmem:[#allocation6 + $0x50] sm:$0xff]   ;;  %v801_v16 = vld [vmem:[#allocation6 + $0x58] sm:$0xff]   ;;  %v92_v17 = vld [vmem:[#allocation3] sm:$0xff]  ;;  %v1083_v25 = vsub.s32 0, %v1077_v22  ;;  %89 = vst.msk [vmem:[#allocation12] sm:$0x3] %vm1117_vm5, %v971_v2 }
  0x33   :  { %v1072_v18 = vpack.c.bf16 %v971_v2, %v92_v17  ;;  %v505_v20 = vld [vmem:[#allocation2] sm:$0x1]  ;;  %s976_s4 = smov [#allocation8]  }
  0x34   :  { %508 = vperm.xlu0 %788, %v505_v20   ;;  %v480_v23 = vld [vmem:[%s1181_s2] sm:$0x1]  ;;  %s677_s15 = sshll.u32 %s976_s4, 4  ;;  %s678_s15 = int_to_ptr.vmem [resolvable:$true] %s677_s15 }
  0x35   :  { %378 = vmatpush1.bf16.msra.mxu0 %v791_v4  ;;  %v482_v24 = vpack.i.b16 %v480_v23, %v480_v23 }
  0x36   :  { %379 = vmatprep.subr.bf16.mxu0 %v970_v1 }
  0x37   :  { %v1086_v28 = vrot.slane %v482_v24, %v1083_v25 }
  0x39   :  { %380 = vmatpush1.bf16.msra.mxu0 %v792_v5 }
  0x3a   :  { %381 = vmatprep.subr.bf16.mxu0 %v970_v1 }
  0x3d   :  { %382 = vmatpush1.bf16.msra.mxu0 %v793_v6 }
  0x3e   :  { %383 = vmatprep.subr.bf16.mxu0 %v970_v1 }
  0x41   :  { %384 = vmatpush1.bf16.msra.mxu0 %v794_v9 }
  0x42   :  { %385 = vmatprep.subr.bf16.mxu0 %v970_v1 }
  0x45   :  { %386 = vmatpush1.bf16.msra.mxu0 %v795_v10 }
  0x46   :  { %387 = vmatprep.subr.bf16.mxu0 %v970_v1 }
  0x49   :  { %388 = vmatpush1.bf16.msra.mxu0 %v796_v11 }
  0x4a   :  { %389 = vmatprep.subr.bf16.mxu0 %v970_v1 }
  0x4d   :  { %390 = vmatpush1.bf16.msra.mxu0 %v797_v12 }
  0x4e   :  { %391 = vmatprep.subr.bf16.mxu0 %v970_v1 }
  0x51   :  { %392 = vmatpush1.bf16.msra.mxu0 %v798_v13 }
  0x52   :  { %393 = vmatprep.subr.bf16.mxu0 %v970_v1 }
  0x55   :  { %394 = vmatpush1.bf16.msra.mxu0 %v799_v14 }
  0x56   :  { %395 = vmatprep.subr.bf16.mxu0 %v970_v1 }
  0x59   :  { %396 = vmatpush1.bf16.msra.mxu0 %v800_v15 }
  0x5a   :  { %397 = vmatprep.subr.bf16.mxu0 %v970_v1 }
  0x5d   :  { %398 = vmatpush1.bf16.msra.mxu0 %v801_v16 }
  0x60   :  { %408 = vmatmul.mubr.bf16.vlgmr.msra.gmra.mrb[0].mxu0 %v1072_v18 }
  0x61   :  { %415 = vmatprep.mubr.bf16.mxu0 %v972_v19 }
  0x68   :  { %416 = vmatmul.mubr.bf16.gmra.mrb[4].mxu0 %v972_v19 }
  0x69   :  { %423 = vmatprep.mubr.bf16.mxu0 %v972_v19 }
  0x70   :  { %424 = vmatmul.mubr.bf16.gmra.mrb[8].mxu0 %v972_v19 }
  0x71   :  { %431 = vmatprep.mubr.bf16.mxu0 %v972_v19 }
  0x78   :  { %432 = vmatmul.mubr.bf16.gmra.mrb[12].mxu0 %v972_v19 }
  0x79   :  { %439 = vmatprep.mubr.bf16.mxu0 %v972_v19 }
  0x80   :  { %440 = vmatmul.mubr.bf16.gmra.mrb[16].mxu0 %v972_v19 }
  0x81   :  { %447 = vmatprep.mubr.bf16.mxu0 %v972_v19 }
  0x88   :  { %448 = vmatmul.mubr.bf16.gmra.mrb[20].mxu0 %v972_v19 }
  0x89   :  { %455 = vmatprep.mubr.bf16.mxu0 %v972_v19 }
  0x90   :  { %456 = vmatmul.mubr.bf16.gmra.mrb[24].mxu0 %v972_v19 }
  0x91   :  { %463 = vmatprep.mubr.bf16.mxu0 %v972_v19 }
  0x98   :  { %464 = vmatmul.mubr.bf16.gmra.mrb[28].mxu0 %v972_v19 }
 0x133   :  { %v409_v26 = vpop.f32.mrb[0].mxu0 }
 0x134   :  { %v411_v27 = vpop.f32.mrb[1].mxu0 }
 0x135   :  { %v412_v29 = vpop.f32.mrb[2].mxu0  ;;  %v974_v27 = vmov -1e+30  }
 0x136   :  { %v472_v30 = vpack.c.bf16 %v412_v29, %v409_v26  ;;  %v414_v31 = vpop.f32.mrb[3].mxu0  ;;  %v504_v26 = vld [vmem:[%s1182_s3] sm:$0x1]  ;;  %83 = vst.msk [vmem:[#allocation9] sm:$0x1] %vm82_vm2, %v974_v27  ;;  %v556_v29 = vand.u32 127, %v85_v21 }
 0x137   :  { %s975_s3 = smov [#allocation9]  }
 0x138   :  { %v488_v32 = vadd.bf16 %v1086_v28, %v472_v30  ;;  %vm558_vm3 = vcmp.lt.s32.totalorder %v556_v29, 8  ;;  %s687_s14 = sshll.u32 %s975_s3, 4  ;;  %s688_s14 = int_to_ptr.vmem [resolvable:$true] %s687_s14 }
 0x139   :  { %s866_s16 = scalar_lea.vmem %s688_s14, 16  ;;  %s870_s17 = scalar_lea.vmem %s688_s14, 32 }
 0x13a   :  { %802 = vtanh.bf16 %v488_v32  ;;  %p867_p2 = scmp.ne.s32.totalorder %s688_s14, %s866_s16  ;;  %p871_p3 = scmp.lt.s32.totalorder %s688_s14, %s688_s14 }
 0x13b   :  { %v417_v33 = vpop.f32.mrb[4].mxu0  ;;  %p872_p4 = scmp.lt.s32.totalorder %s870_s17, %s866_s16 }
 0x13c   :  { %v419_v34 = vpop.f32.mrb[5].mxu0 }
 0x13d   :  { %v420_v35 = vpop.f32.mrb[6].mxu0  ;;  %p873_p5 = por %p872_p4, %p871_p3 }
 0x13e   :  { %v473_v36 = vpack.c.bf16 %v420_v35, %v417_v33  ;;  %v422_v37 = vpop.f32.mrb[7].mxu0  ;;  %v561_v35 = vld [vmem:[#allocation9] sm:$0x1] }
 0x13f   :  { %p874_p6 = pnand %p873_p5, %p867_p2 }
 0x140   :  { %v489_v38 = vadd.bf16 %v1086_v28, %v473_v36 }
 0x142   :  { %804 = vtanh.bf16 %v489_v38 }
 0x143   :  { %v425_v39 = vpop.f32.mrb[8].mxu0 }
 0x144   :  { %v427_v40 = vpop.f32.mrb[9].mxu0 }
 0x145   :  { %v803_v41 = vpop.eup %802  ;;  %v428_v42 = vpop.f32.mrb[10].mxu0 }
 0x146   :  { %v474_v43 = vpack.c.bf16 %v428_v42, %v425_v39  ;;  %v430_v44 = vpop.f32.mrb[11].mxu0  ;;  %753 = vmatpush3.bf16.xpose.msra.mxu1 %v803_v41 }
 0x147   :  { %754 = vmatprep.subr.bf16.mxu1 %v971_v2 }
 0x148   :  { %v490_v45 = vadd.bf16 %v1086_v28, %v474_v43 }
 0x14a   :  { %806 = vtanh.bf16 %v490_v45 }
 0x14b   :  { %v433_v46 = vpop.f32.mrb[12].mxu0 }
 0x14c   :  { %v435_v47 = vpop.f32.mrb[13].mxu0 }
 0x14d   :  { %v805_v48 = vpop.eup %804  ;;  %v436_v49 = vpop.f32.mrb[14].mxu0 }
 0x14e   :  { %v475_v50 = vpack.c.bf16 %v436_v49, %v433_v46  ;;  %v438_v51 = vpop.f32.mrb[15].mxu0  ;;  %755 = vmatpush3.bf16.xpose.msra.mxu1 %v805_v48 }
 0x14f   :  { %756 = vmatprep.subr.bf16.mxu1 %v971_v2 }
 0x150   :  { %v491_v52 = vadd.bf16 %v1086_v28, %v475_v50 }
 0x152   :  { %808 = vtanh.bf16 %v491_v52 }
 0x153   :  { %v441_v53 = vpop.f32.mrb[16].mxu0 }
 0x154   :  { %v443_v54 = vpop.f32.mrb[17].mxu0 }
 0x155   :  { %v807_v55 = vpop.eup %806  ;;  %v444_v56 = vpop.f32.mrb[18].mxu0 }
 0x156   :  { %v476_v57 = vpack.c.bf16 %v444_v56, %v441_v53  ;;  %v446_v58 = vpop.f32.mrb[19].mxu0  ;;  %757 = vmatpush3.bf16.xpose.msra.mxu1 %v807_v55 }
 0x157   :  { %758 = vmatprep.subr.bf16.mxu1 %v971_v2 }
 0x158   :  { %v492_v59 = vadd.bf16 %v1086_v28, %v476_v57 }
 0x15a   :  { %810 = vtanh.bf16 %v492_v59 }
 0x15b   :  { %v449_v60 = vpop.f32.mrb[20].mxu0 }
 0x15c   :  { %v451_v61 = vpop.f32.mrb[21].mxu0 }
 0x15d   :  { %v809_v62 = vpop.eup %808  ;;  %v452_v63 = vpop.f32.mrb[22].mxu0 }
 0x15e   :  { %v477_v0 = vpack.c.bf16 %v452_v63, %v449_v60  ;;  %v454_v3 = vpop.f32.mrb[23].mxu0  ;;  %759 = vmatpush3.bf16.xpose.msra.mxu1 %v809_v62 }
 0x15f   :  { %760 = vmatprep.subr.bf16.mxu1 %v971_v2 }
 0x160   :  { %v493_v4 = vadd.bf16 %v1086_v28, %v477_v0 }
 0x162   :  { %812 = vtanh.bf16 %v493_v4 }
 0x163   :  { %v457_v5 = vpop.f32.mrb[24].mxu0 }
 0x164   :  { %v459_v6 = vpop.f32.mrb[25].mxu0 }
 0x165   :  { %v811_v7 = vpop.eup %810  ;;  %v460_v9 = vpop.f32.mrb[26].mxu0 }
 0x166   :  { %v478_v10 = vpack.c.bf16 %v460_v9, %v457_v5  ;;  %v462_v11 = vpop.f32.mrb[27].mxu0  ;;  %761 = vmatpush3.bf16.xpose.msra.mxu1 %v811_v7 }
 0x167   :  { %762 = vmatprep.subr.bf16.mxu1 %v971_v2 }
 0x168   :  { %v494_v12 = vadd.bf16 %v1086_v28, %v478_v10 }
 0x16a   :  { %814 = vtanh.bf16 %v494_v12 }
 0x16b   :  { %v465_v13 = vpop.f32.mrb[28].mxu0 }
 0x16c   :  { %v467_v14 = vpop.f32.mrb[29].mxu0 }
 0x16d   :  { %v813_v15 = vpop.eup %812  ;;  %v468_v16 = vpop.f32.mrb[30].mxu0 }
 0x16e   :  { %v479_v17 = vpack.c.bf16 %v468_v16, %v465_v13  ;;  %v470_v19 = vpop.f32.mrb[31].mxu0  ;;  %763 = vmatpush3.bf16.xpose.msra.mxu1 %v813_v15 }
 0x16f   :  { %764 = vmatprep.subr.bf16.mxu1 %v971_v2 }
 0x170   :  { %v495_v20 = vadd.bf16 %v1086_v28, %v479_v17  ;;  %v509_v28 = vpop.permute.xlu0 %508 }
 0x172   :  { %816 = vtanh.bf16 %v495_v20 }
 0x175   :  { %v815_v23 = vpop.eup %814 }
 0x176   :  { %765 = vmatpush3.bf16.xpose.msra.mxu1 %v815_v23 }
 0x177   :  { %766 = vmatprep.subr.bf16.mxu1 %v971_v2 }
 0x17d   :  { %v817_v24 = vpop.eup %816 }
 0x17e   :  { %767 = vmatpush3.bf16.xpose.msra.mxu1 %v817_v24 }
 0x17f   :  { %602 = vmatprep.subr.bf16.mxu1 %v1060_v8  ;;  %v514_v8 = vrot.slane %v509_v28, %v1083_v25 }
 0x185   :  { %769 = vmatmul.mubr.bf16.vlgmr.msra.gmra.mrb[0].mxu1 %v504_v26 }
 0x186   :  { %603 = vmatpush1.bf16.msra.mxu1 %v1072_v18  ;;  %634 = vmatprep.mubr.bf16.mxu1 %v970_v1 }
 0x258   :  { %v549_v30 = vpop.f32.mrb[0].mxu1 }
 0x259   :  { %v550_v31 = vadd.f32 %v549_v30, %v514_v8  ;;  %v770_v32 = vpop.f32.mrb[1].mxu1 }
 0x25a   :  { %v552_v18 = vpop.f32.mrb[2].mxu1 }
 0x25b   :  { %v559_v33 = vsel %vm558_vm3, %v550_v31, -1e+30  ;;  %v771_v1 = vpop.f32.mrb[3].mxu1 }
 0x25c   :  { %560 = vst [vmem:[#allocation8] sm:$0x1] %v559_v33  ;;  %v563_v34 = vsel %vm562_vm4, %v559_v33, -inf }
 0x25d   :  { %564 = vmax.xlane.f32.xlu0 %v563_v34 }
 0x2ea   :  { %v565_v36 = vpop.xlane.xlu0 %564 }
 0x2eb   :  { %v566_v37 = vmax.f32 %v561_v35, %v565_v36 }
 0x2ed   :  { %v567_v38 = vsub.f32 %v561_v35, %v566_v37  ;;  %667 = vst.msk [vmem:[#allocation9] sm:$0x1] %vm82_vm2, %v566_v37  ;;  %572 = vperm.xlu1 %789, %v566_v37  }
 0x2ef   :  { %v568_v39 = vmul.f32 1.442695, %v567_v38 }
 0x2f1   :  { %818 = vpow2.f32 %v568_v39 }
 0x2fb   :  { %v819_v41 = vpop.eup %818 }
 0x2fc   :  { %593 = vperm.xlu0 %788, %v819_v41  }
 0x36c   :  { %v573_v42 = vpop.permute.xlu1 %572 }
 0x36d   :  { %v578_v43 = vrot.slane %v573_v42, %v1083_v25 }
 0x36f   :  { %v579_v44 = vsub.f32 %v559_v33, %v578_v43 }
 0x371   :  { %v580_v45 = vmul.f32 1.442695, %v579_v44 }
 0x373   :  { %820 = vpow2.f32 %v580_v45 }
 0x37d   :  { %v821_v46 = vpop.eup %820 }
 0x37e   :  { %v584_v47 = vsel %vm562_vm4, %v821_v46, 0.0  ;;  %v601_v48 = vpack.c.bf16 %v821_v46, %v821_v46 }
 0x37f   :  { %585 = vadd.xlane.f32.xlu1 %v584_v47 }
 0x380   :  { %635 = vmatmul.mubr.bf16.vlgmr.msra.gmra.mrb[4].mxu1 %v601_v48 }
 0x381   :  { %877 = shalt.err (!%p874_p6)
}
 0x382   :  { %s878_s20 = scalar_lea.hbm %s1185_s6, 16 }
 0x383   :  { %p879_p7 = scmp.ne.s32.totalorder %s1185_s6, %s878_s20  ;;  %p882_p8 = scmp.lt.u32.totalorder %s878_s20, %s1185_s6 }
 0x385   :  { %p884_p9 = pnand %p882_p8, %p879_p7 }
 0x387   :  { %887 = shalt.err (!%p884_p9)
}
 0x388   :  { %690 = dma.vmem_to_hbm [thread:$0]  %s688_s14, 16, %s1185_s6, [#allocation10]  }
 0x389   :  { %s888_s27 = scalar_lea.vmem %s678_s15, 16  ;;  %s892_s28 = scalar_lea.vmem %s678_s15, 32 }
 0x38a   :  { %p889_p10 = scmp.ne.s32.totalorder %s678_s15, %s888_s27  ;;  %p893_p11 = scmp.lt.s32.totalorder %s678_s15, %s678_s15 }
 0x38b   :  { %p894_p12 = scmp.lt.s32.totalorder %s892_s28, %s888_s27 }
 0x38d   :  { %p895_p13 = por %p894_p12, %p893_p11 }
 0x38f   :  { %p896_p0 = pnand %p895_p13, %p889_p10 }
 0x391   :  { %899 = shalt.err (!%p896_p0)
}
 0x392   :  { %s900_s0 = scalar_lea.hbm %s1184_s5, 16 }
 0x393   :  { %p901_p1 = scmp.ne.s32.totalorder %s1184_s5, %s900_s0  ;;  %p904_p2 = scmp.lt.u32.totalorder %s900_s0, %s1184_s5 }
 0x395   :  { %p906_p3 = pnand %p904_p2, %p901_p1 }
 0x397   :  { %909 = shalt.err (!%p906_p3)
}
 0x398   :  { %680 = dma.vmem_to_hbm [thread:$0]  %s678_s15, 16, %s1184_s5, [#allocation5]   ;;  %v582_v2 = vld [vmem:[#allocation11] sm:$0x1] }
 0x399   :  { %s977_s2 = smov [#allocation11]   ;;  %v583_v21 = vmul.f32 %v819_v41, %v582_v2 }
 0x39a   :  { %s697_s13 = sshll.u32 %s977_s2, 4  ;;  %s698_s13 = int_to_ptr.vmem [resolvable:$true] %s697_s13 }
 0x39b   :  { %s910_s3 = scalar_lea.vmem %s698_s13, 16  ;;  %s914_s14 = scalar_lea.vmem %s698_s13, 32 }
 0x39c   :  { %p911_p4 = scmp.ne.s32.totalorder %s698_s13, %s910_s3  ;;  %p915_p5 = scmp.lt.s32.totalorder %s698_s13, %s698_s13 }
 0x39d   :  { %p916_p6 = scmp.lt.s32.totalorder %s914_s14, %s910_s3 }
 0x39f   :  { %p917_p7 = por %p916_p6, %p915_p5 }
 0x3a1   :  { %p918_p8 = pnand %p917_p7, %p911_p4 }
 0x40c   :  { %v586_v49 = vpop.xlane.xlu1 %585 }
 0x40d   :  { %v587_v50 = vadd.f32 %v586_v49, %v583_v21 }
 0x40f   :  { %589 = vst.msk [vmem:[#allocation11] sm:$0x1] %vm82_vm2, %v587_v50 }
 0x410   :  { %921 = shalt.err (!%p918_p8)
}
 0x411   :  { %s922_s5 = scalar_lea.hbm %s1186_s7, 16 }
 0x412   :  { %p923_p9 = scmp.ne.s32.totalorder %s1186_s7, %s922_s5  ;;  %p926_p10 = scmp.lt.u32.totalorder %s922_s5, %s1186_s7 }
 0x414   :  { %p928_p11 = pnand %p926_p10, %p923_p9 }
 0x416   :  { %931 = shalt.err (!%p928_p11)
}
 0x417   :  { %700 = dma.vmem_to_hbm [thread:$0]  %s698_s13, 16, %s1186_s7, [#allocation10]   ;;  %v978_v51 = vmov 1966171168   ;;  %v594_v54 = vpop.permute.xlu0 %593  ;;  %v590_v61 = vld [vmem:[#allocation12] sm:$0x3] }
 0x418   :  { %v647_v52 = vunpack.c.l.s4 %v978_v51  ;;  %v599_v58 = vrot.slane %v594_v54, %v1083_v25  ;;  %s979_s22 = smov [#allocation12]  }
 0x419   :  { %s707_s23 = sshll.u32 %s979_s22, 4  ;;  %s708_s23 = int_to_ptr.vmem [resolvable:$true] %s707_s23 }
 0x41a   :  { %v648_v53 = vunpack.c.0.s8 %v647_v52  ;;  %v600_v0 = vmul.f32 %v599_v58, %v590_v61  ;;  %s932_s7 = scalar_lea.vmem %s708_s23, 32  ;;  %p937_p13 = scmp.lt.s32.totalorder %s708_s23, %s708_s23 }
 0x41b   :  { %p933_p12 = scmp.ne.s32.totalorder %s708_s23, %s932_s7  ;;  %p938_p0 = scmp.lt.s32.totalorder %s932_s7, %s932_s7 }
 0x41c   :  { %v651_v56 = vsub.s32 %v648_v53, %v1077_v22 }
 0x41d   :  { %p939_p1 = por %p938_p0, %p937_p13 }
 0x41f   :  { %p940_p2 = pnand %p939_p1, %p933_p12 }
 0x453   :  { %v636_v55 = vpop.f32.mrb[4].mxu1 }
 0x454   :  { %v638_v57 = vpop.f32.mrb[5].mxu1 }
 0x455   :  { %v645_v59 = vcombine.low %v636_v55, %v638_v57  ;;  %v640_v60 = vpop.f32.mrb[6].mxu1 }
 0x456   :  { %v641_v62 = vpop.f32.mrb[7].mxu1 }
 0x457   :  { %v652_v63 = vrot.slane %v645_v59, %v651_v56 }
 0x459   :  { %v659_v3 = vrot.slane %v652_v63, %v651_v56 }
 0x45b   :  { %v661_v4 = vadd.f32 %v659_v3, %v600_v0 }
 0x45d   :  { %666 = vst.msk [vmem:[#allocation12] sm:$0x3] %vm1117_vm5, %v661_v4 }
 0x45e   :  { %943 = shalt.err (!%p940_p2)
}
 0x45f   :  { %s944_s26 = scalar_lea.hbm %s1187_s8, 32 }
 0x460   :  { %p945_p3 = scmp.ne.s32.totalorder %s1187_s8, %s944_s26  ;;  %p948_p4 = scmp.lt.u32.totalorder %s944_s26, %s1187_s8 }
 0x462   :  { %p950_p5 = pnand %p948_p4, %p945_p3 }
 0x464   :  { %953 = shalt.err (!%p950_p5)
}
 0x465   :  { %710 = dma.vmem_to_hbm [thread:$0]  %s708_s23, 32, %s1187_s8, [#allocation13]  }
 0x466   :  { %958 = dma.done.wait [#allocation5], 16  }
 0x467   :  { %959 = vsyncadd [#allocation5], 4294967280 }
 0x468   :  { %960 = dma.done.wait [#allocation10], 32  }
 0x469   :  { %961 = vsyncadd [#allocation10], 4294967264 }
 0x46a   :  { %962 = dma.done.wait [#allocation13], 32  }
 0x46b   :  { %963 = vsyncadd [#allocation13], 4294967264 }
 0x46c   :  { %723 = vsyncpa [#allocation4], 1 }
 0x46d   :  { %724 = vsyncpa [#allocation7], 1 }
 0x46e   :  { %725 = vsyncpa [#allocation5], 1 }
 0x46f   :  { %726 = vsyncpa [#allocation10], 1 }
 0x470   :  { %727 = vsyncpa [#allocation13], 1 }

</bundles_post_ra>
